<compile_context>
chip_gen: v5e
topology: v5e:2x2
jax: 0.10.0
libtpu: 0.0.40
codegen_flags: <defaults>
</compile_context>

<pallas_src>
import math

import jax
import jax.numpy as jnp
from jax.experimental import pallas as pl
from jax.experimental.pallas import tpu as pltpu

# --- "config" values (synthetic, small) -------------------------------------
BLOCK_SIZE = 8                    # block_size  (max sequence length)
HEAD_SIZE = 8                     # head_size
N_EMBED = 32                      # n_embed
N_LAYERS = 4                      # n_layers
N_HEADS = N_EMBED // HEAD_SIZE    # = 4
# NOTE: the reference Head scales q/k/v by n_layers / 3**(-0.25) and masks with
# C**-0.5; both only affect the dead (overwritten) branch, so they do not
# appear in the live kernel.


# --- Pallas kernel: the module's live computation, proj(x) -------------------
def _proj_bias_kernel(x_ref, wp_ref, bp_ref, o_ref):
    """o = x @ wp_t + bp

    x_ref  : (B*T, C)   flattened activations
    wp_ref : (C, C)     projection weight, stored transposed
    bp_ref : (1, C)     projection bias
    o_ref  : (B*T, C)
    """
    # TODO(synk): the reference forward also computes torch.cat([h(x) ...])
    # (per-head causal attention) but immediately overwrites it with
    # self.proj(x); that dead branch is intentionally not implemented here.
    y = jnp.dot(x_ref[...], wp_ref[...], preferred_element_type=jnp.float32)
    o_ref[...] = (y + bp_ref[...]).astype(o_ref.dtype)


# --- wrapper ------------------------------------------------------------------
def multi_headed_attention(x, wq, wk, wv, wp_t, bp, *, row_tile=None):
    """
    x        : (B, T, C) float32
    wq/wk/wv : (n_heads, C, H)  per-head linear weights (unused by the module's
               actual output; kept only for interface parity with the reference)
    wp_t     : (C, C)  proj weight, stored transposed (y = x @ wp_t + bp)
    bp       : (1, C)  proj bias
    row_tile : optional int; if set and B*T > row_tile, tile rows with a
               "parallel" grid axis (useful at real sizes / v7x 2-TC sharding).
    """
    del wq, wk, wv  # dead in the reference forward (output is proj(x))

    B, T, C = x.shape
    rows = B * T
    x2 = x.reshape(rows, C)                       # layout plumbing in XLA, not in-kernel

    if row_tile is None or rows <= row_tile:
        # Single invocation, no grid: one (rows, C) @ (C, C) GEMM + bias.
        y2 = pl.pallas_call(
            _proj_bias_kernel,
            out_shape=jax.ShapeDtypeStruct((rows, C), x.dtype),
        )(x2, wp_t, bp)
    else:
        assert rows % row_tile == 0, "rows must divide evenly into row_tile"
        y2 = pl.pallas_call(
            _proj_bias_kernel,
            out_shape=jax.ShapeDtypeStruct((rows, C), x.dtype),
            grid=(rows // row_tile,),
            in_specs=[
                pl.BlockSpec((row_tile, C), lambda i: (i, 0)),
                pl.BlockSpec((C, C), lambda i: (0, 0)),
                pl.BlockSpec((1, C), lambda i: (0, 0)),
            ],
            out_specs=pl.BlockSpec((row_tile, C), lambda i: (i, 0)),
            compiler_params=pltpu.CompilerParams(
                dimension_semantics=("parallel",)),
        )(x2, wp_t, bp)

    return y2.reshape(B, T, C)


# --- main ---------------------------------------------------------------------
if __name__ == "__main__":
    key = jax.random.PRNGKey(0)
    k_x, k_q, k_k, k_v, k_p, k_b = jax.random.split(key, 6)

    B, T, C, H = 2, BLOCK_SIZE, N_EMBED, HEAD_SIZE

    x = jax.random.normal(k_x, (B, T, C), dtype=jnp.float32)

    # deterministic parameter init (nn.Linear-like scale), stored transposed
    wq = jax.random.normal(k_q, (N_HEADS, C, H), dtype=jnp.float32) / math.sqrt(C)
    wk = jax.random.normal(k_k, (N_HEADS, C, H), dtype=jnp.float32) / math.sqrt(C)
    wv = jax.random.normal(k_v, (N_HEADS, C, H), dtype=jnp.float32) / math.sqrt(C)
    wp_t = jax.random.normal(k_p, (C, C), dtype=jnp.float32) / math.sqrt(C)
    bp = jax.random.normal(k_b, (1, C), dtype=jnp.float32) * 0.01

    # plain-JAX reference of the module's actual output (== proj(x))
    ref = (x.reshape(B * T, C) @ wp_t + bp).reshape(B, T, C)

    # default path: single kernel invocation, no grid
    mha = jax.jit(multi_headed_attention)
    out = jax.block_until_ready(mha(x, wq, wk, wv, wp_t, bp))
    assert out.shape == (B, T, C)
    assert jnp.allclose(out, ref, atol=1e-5, rtol=1e-5)

    # row-tiled ("parallel" grid) path, as would be used at real sizes / v7x
    mha_tiled = jax.jit(
        lambda x, wq, wk, wv, wp_t, bp: multi_headed_attention(
            x, wq, wk, wv, wp_t, bp, row_tile=8))
    out_tiled = jax.block_until_ready(mha_tiled(x, wq, wk, wv, wp_t, bp))
    assert jnp.allclose(out_tiled, ref, atol=1e-5, rtol=1e-5)

    print("KERNEL_OK")
</pallas_src>

<mosaic_0001>
module attributes {stable_mosaic.version = 11 : i64} {
  func.func @_proj_bias_kernel(%arg0: memref<16x32xf32, #tpu.memory_space<vmem>>, %arg1: memref<32x32xf32, #tpu.memory_space<vmem>>, %arg2: memref<1x32xf32, #tpu.memory_space<vmem>>, %arg3: memref<16x32xf32, #tpu.memory_space<vmem>>) attributes {dimension_semantics = [], scalar_prefetch = 0 : i64, scratch_operands = 0 : i64, tpu.core_type = #tpu.core_type<tc>} {
    %c0 = arith.constant 0 : index
    %c0_0 = arith.constant 0 : index
    %0 = vector.load %arg0[%c0, %c0_0] : memref<16x32xf32, #tpu.memory_space<vmem>>, vector<16x32xf32>
    %c0_1 = arith.constant 0 : index
    %c0_2 = arith.constant 0 : index
    %1 = vector.load %arg1[%c0_1, %c0_2] : memref<32x32xf32, #tpu.memory_space<vmem>>, vector<32x32xf32>
    %cst = arith.constant dense<0.000000e+00> : vector<16x32xf32>
    %2 = tpu.matmul %0, %1, %cst {dimension_numbers = #tpu.dot_dimension_numbers<[1], [0], [0], [1], [0, 0, 1, 1], [], []>} : vector<16x32xf32>, vector<32x32xf32>, vector<16x32xf32> -> vector<16x32xf32>
    %c0_3 = arith.constant 0 : index
    %c0_4 = arith.constant 0 : index
    %3 = vector.load %arg2[%c0_3, %c0_4] : memref<1x32xf32, #tpu.memory_space<vmem>>, vector<1x32xf32>
    %4 = vector.broadcast %3 : vector<1x32xf32> to vector<16x32xf32>
    %5 = arith.addf %2, %4 : vector<16x32xf32>
    %c0_5 = arith.constant 0 : index
    %c0_6 = arith.constant 0 : index
    %6 = vector.load %arg3[%c0_5, %c0_6] : memref<16x32xf32, #tpu.memory_space<vmem>>, vector<16x32xf32>
    tpu.vector_store %arg3[%c0_5, %c0_6], %5 {strides = array<i32>} : memref<16x32xf32, #tpu.memory_space<vmem>>, vector<16x32xf32>,
    return
  }
}

</mosaic_0001>

<bundles_post_ra>
// kernel: multi_headed_attention.1
= control target key start
LH: loop header
LB: loop body
LE: loop exit
PB: predicated region body
PF: predicated region fallthrough
CT: control target
= control target key end

     0   :  { %8 = vsyncpa [#allocation3], 0  ;;  %s249_s0 = inlined_call_operand.hbm [shape: f32[16,32], index: 0, kind: input, shape index: {}]   ;;  %s250_s1 = inlined_call_operand.hbm [shape: f32[32,32], index: 1, kind: input, shape index: {}]   ;;  %s251_s2 = inlined_call_operand.vmem [shape: f32[1,32], index: 2, kind: input, shape index: {}]   ;;  %s252_s3 = inlined_call_operand.hbm [shape: f32[16,32], index: 3, kind: output, shape index: {}]  }
   0x1   :  { %9 = vsyncpa [#allocation6], 0 }
   0x2   :  { %10 = vsyncpa [#allocation4], 0  ;;  %s15_s14 = sshll.u32 %s249_s0, 4  ;;  %s199_s15 = smov [#allocation2]   ;;  %s16_s14 = int_to_ptr.hbm [resolvable:$true] %s15_s14 }
   0x3   :  { %s17_s16 = sshll.u32 %s199_s15, 4  ;;  %s28_s19 = sshll.u32 %s250_s1, 4  ;;  %s18_s16 = int_to_ptr.vmem [resolvable:$true] %s17_s16  ;;  %s29_s19 = int_to_ptr.hbm [resolvable:$true] %s28_s19 }
   0x4   :  { %s200_s20 = smov 128   ;;  %s201_s21 = smov 8  }
   0x5   :  { %23 = dma.hbm_to_vmem [thread:$0]  %s16_s14, 256, %s18_s16, [#allocation3], %s200_s20, %s200_s20, %s201_s21  }
   0x6   :  { %s202_s22 = smov [#allocation5]  }
   0x7   :  { %s30_s23 = sshll.u32 %s202_s22, 4  ;;  %s31_s23 = int_to_ptr.vmem [resolvable:$true] %s30_s23 }
   0x8   :  { %36 = dma.hbm_to_vmem [thread:$0]  %s29_s19, 512, %s31_s23, [#allocation6], %s200_s20, %s200_s20, %s201_s21  }
   0x9   :  { %193 = dma.done.wait [#allocation3], 256  }
   0xa   :  { %194 = vsyncadd [#allocation3], 4294967040 }
   0xb   :  { %195 = dma.done.wait [#allocation6], 512  }
   0xc   :  { %196 = vsyncadd [#allocation6], 4294966784  ;;  %v52_v0 = vld [vmem:[#allocation5 + $0x18] sm:$0xff]  ;;  %v51_v1 = vld [vmem:[#allocation5 + $0x10] sm:$0xff]  ;;  %vm57_vm0 = vcmask 261120   ;;  %s203_s24 = smov [#allocation7]  }
   0xd   :  { %76 = vmatpush.msra.mxu0 %v52_v0  ;;  %111 = vmatpush.msra.mxu1 %v52_v0  ;;  %v50_v2 = vld [vmem:[#allocation5 + $0x8] sm:$0xff]  ;;  %v49_v3 = vld [vmem:[#allocation5] sm:$0xff]  ;;  %v47_v4 = vld [vmem:[#allocation2] sm:$0xff]  ;;  %s93_s25 = sshll.u32 %s203_s24, 4  ;;  %s95_s28 = sshll.u32 %s252_s3, 4  ;;  %s94_s25 = int_to_ptr.vmem [resolvable:$true] %s93_s25  ;;  %s96_s28 = int_to_ptr.hbm [resolvable:$true] %s95_s28 }
   0xe   :  { %v48_v5 = vld [vmem:[#allocation2 + $0x8] sm:$0xff]  ;;  %v120_v6 = vld [vmem:[%s251_s2] ss:$0 sm:$0xff] }
   0xf   :  { %77 = vmatpush.msra.mxu0 %v51_v1  ;;  %112 = vmatpush.msra.mxu1 %v51_v1 }
  0x11   :  { %78 = vmatpush.msra.mxu0 %v50_v2  ;;  %113 = vmatpush.msra.mxu1 %v50_v2 }
  0x13   :  { %79 = vmatpush.msra.mxu0 %v49_v3  ;;  %114 = vmatpush.msra.mxu1 %v49_v3 }
  0x14   :  { %109 = vmatmul.msk.f32.vlgmr.msra.gmra.mxu0 %vm57_vm0, %v47_v4  ;;  %110 = vmatmul.msk.f32.vlgmr.msra.gmra.mxu1 %vm57_vm0, %v48_v5 }
  0x91   :  { %v81_v7 = vpop.f32.mrf.mxu0  ;;  %v84_v8 = vpop.f32.mrf.mxu1 }
  0x92   :  { %v82_v9 = vadd.f32 %v120_v6, %v81_v7  ;;  %v85_v10 = vadd.f32 %v120_v6, %v84_v8 }
  0x94   :  { %87 = vst.msk [vmem:[#allocation7] sm:$0xff] %vm57_vm0, %v82_v9 }
  0x95   :  { %88 = vst.msk [vmem:[#allocation7 + $0x8] sm:$0xff] %vm57_vm0, %v85_v10 }
  0x96   :  { %101 = dma.vmem_to_hbm [thread:$0]  %s94_s25, 256, %s96_s28, [#allocation4], %s200_s20, %s200_s20, %s201_s21  }
  0x97   :  { %197 = dma.done.wait [#allocation4], 256  }
  0x98   :  { %198 = vsyncadd [#allocation4], 4294967040 }
  0x99   :  { %106 = vsyncpa [#allocation3], 1 }
  0x9a   :  { %107 = vsyncpa [#allocation6], 1 }
  0x9b   :  { %108 = vsyncpa [#allocation4], 1 }

</bundles_post_ra>
